<compile_context>
chip_gen: v7x
topology: tpu7x:2x2x1
jax: 0.10.0
libtpu: 0.0.40
codegen_flags: <defaults>
</compile_context>

<pallas_src>
import functools

import jax
import jax.numpy as jnp
from jax.experimental import pallas as pl
from jax.experimental.pallas import tpu as pltpu

BN_EPS = 1e-5


# ----------------------------- Pallas kernels --------------------------------


def _silu(z):
    # f32 epilogue on purpose (v5e has no bf16 VPU/EUP); cast at the store.
    return z * jax.nn.sigmoid(z)


def _dual_conv1x1_kernel(x_ref, w_ref, b_ref, oa_ref, ob_ref, *, ca):
    """cv1 and cv2 fused into a single stacked matmul over a shared x tile.

    x_ref : (1, Cin, tm) bf16   w_ref : (Ca+Cb, Cin) bf16 (BN scale folded in)
    b_ref : (Ca+Cb, 1)  f32     oa/ob : (1, Ca/Cb, tm) bf16 (lane-dense)
    """
    x = x_ref[0]
    z = jnp.dot(w_ref[...], x, preferred_element_type=jnp.float32) + b_ref[...]
    s = _silu(z)
    oa_ref[0] = s[:ca].astype(oa_ref.dtype)
    ob_ref[0] = s[ca:].astype(ob_ref.dtype)


def _concat_conv1x1_kernel(a_ref, b_ref, wa_ref, wb_ref, bias_ref, o_ref):
    """cv3(torch.cat([a, b], dim=1)) without materializing the concat:
    out = silu(Wa @ a + Wb @ b + bias)."""
    z = jnp.dot(wa_ref[...], a_ref[0], preferred_element_type=jnp.float32)
    z = z + jnp.dot(wb_ref[...], b_ref[0], preferred_element_type=jnp.float32)
    z = z + bias_ref[...]
    o_ref[0] = _silu(z).astype(o_ref.dtype)


def _bottleneck_kernel(y_ref, mask_ref, w1_ref, b1_ref, w2_ref, b2_ref, o_ref,
                       *, img_w, hw, shortcut):
    """One Bottleneck: 1x1 conv+BN+SiLU -> 3x3 conv+BN+SiLU [+ residual].

    y_ref   : (1, Cin, HW) bf16  -- UNPADDED image, H*W flattened on lanes.
    mask_ref: (9, 1, HW)   f32   -- per-tap validity (0 where the 3x3 tap would
                                    read outside the image / across a row wrap).
    w1      : (Cmid, Cin)   bf16,  b1 (Cmid, 1) f32
    w2      : (Cout, 9*Cmid) bf16 (taps flattened into K), b2 (Cout, 1) f32
    o_ref   : (1, Cout, HW) bf16 -- unpadded layout, stored directly.

    Spatial taps are pltpu.roll's of the 1x1 output on the lane axis (XLU, an
    otherwise idle slot here); the per-tap mask zeroes wrapped-around pixels.
    """
    y = y_ref[0]                                           # (Cin, HW) bf16
    z1 = jnp.dot(w1_ref[...], y, preferred_element_type=jnp.float32)
    u = _silu(z1 + b1_ref[...])                            # (Cmid, HW) f32
    masks = mask_ref[...]                                  # (9, 1, HW) f32

    taps = []
    for k in range(9):                                     # static unroll: 9 taps
        dy, dx = k // 3 - 1, k % 3 - 1
        off = dy * img_w + dx                              # flat source offset
        shift = (-off) % hw                                # np.roll convention
        t = pltpu.roll(u, shift, axis=1) if shift != 0 else u
        taps.append(t * masks[k])                          # zero invalid sources
    # One big MXU matmul (K = 9*Cmid) instead of 9 small K=Cmid matmuls.
    stacked = jnp.concatenate(taps, axis=0).astype(jnp.bfloat16)   # (9*Cmid, HW)
    z2 = jnp.dot(w2_ref[...], stacked, preferred_element_type=jnp.float32)
    out = _silu(z2 + b2_ref[...])
    if shortcut:
        out = out + y.astype(jnp.float32)
    o_ref[0] = out.astype(o_ref.dtype)


# ----------------------------- BN folding / layout helpers -------------------


def _fold_bn(p):
    scale = p["gamma"] / jnp.sqrt(p["var"] + BN_EPS)
    bias = p["beta"] - p["mean"] * scale
    return scale, bias


def _fold_1x1(p):
    """Fold BN scale into the 1x1 conv weight: ((Cout, Cin) bf16, (Cout, 1) f32)."""
    scale, bias = _fold_bn(p)
    w = p["w"][:, :, 0, 0] * scale[:, None]
    return w.astype(jnp.bfloat16), bias[:, None].astype(jnp.float32)


def _fold_3x3(p):
    """Fold BN scale into the 3x3 conv weight and flatten the 9 taps into K:
    (Cout, 9*Cmid) bf16, column order k*Cmid + c (tap-major)."""
    scale, bias = _fold_bn(p)
    w = p["w"] * scale[:, None, None, None]                # (Cout, Cmid, 3, 3)
    cout, cmid = w.shape[0], w.shape[1]
    w_flat = jnp.transpose(w.reshape(cout, cmid, 9), (0, 2, 1))
    w_flat = w_flat.reshape(cout, 9 * cmid)
    return w_flat.astype(jnp.bfloat16), bias[:, None].astype(jnp.float32)


def _tap_masks(H, W):
    """(9, 1, H*W) f32: mask[k][p] = 1 iff 3x3 tap k reads a real pixel at p."""
    row = jnp.arange(H)
    col = jnp.arange(W)
    ms = []
    for k in range(9):
        dy, dx = k // 3 - 1, k % 3 - 1
        rv = (row + dy >= 0) & (row + dy < H)
        cv = (col + dx >= 0) & (col + dx < W)
        m = (rv[:, None] & cv[None, :]).astype(jnp.float32).reshape(1, H * W)
        ms.append(m)
    return jnp.stack(ms, axis=0)


def _pick_tile(hw):
    # These 1x1 kernels are pure HBM bandwidth: per-block VMEM at tm=2048 is
    # tiny, and big lane tiles amortize the ~0.35us per-grid-step overhead.
    for t in (2048, 1024, 512, 256, 128):
        if hw % t == 0:
            return t
    return hw  # small / odd spatial sizes: single full-width block


# ----------------------------- pallas_call wrappers --------------------------


def dual_conv1x1_bn_silu(x, w_stacked, b_stacked, ca):
    """Fused cv1/cv2: one stacked matmul, x read from HBM once."""
    N, Cin, HW = x.shape
    ctot = w_stacked.shape[0]
    cb = ctot - ca
    tm = _pick_tile(HW)
    grid = (N, HW // tm)
    flops = 2 * N * HW * Cin * ctot
    bytes_accessed = (x.size + w_stacked.size) * 2 + b_stacked.size * 4 \
        + N * HW * ctot * 2
    return pl.pallas_call(
        functools.partial(_dual_conv1x1_kernel, ca=ca),
        out_shape=(jax.ShapeDtypeStruct((N, ca, HW), jnp.bfloat16),
                   jax.ShapeDtypeStruct((N, cb, HW), jnp.bfloat16)),
        grid_spec=pltpu.PrefetchScalarGridSpec(
            num_scalar_prefetch=0,
            grid=grid,
            in_specs=[
                pl.BlockSpec((1, Cin, tm), lambda n, j: (n, 0, j)),
                pl.BlockSpec((ctot, Cin), lambda n, j: (0, 0)),
                pl.BlockSpec((ctot, 1), lambda n, j: (0, 0)),
            ],
            out_specs=[
                pl.BlockSpec((1, ca, tm), lambda n, j: (n, 0, j)),
                pl.BlockSpec((1, cb, tm), lambda n, j: (n, 0, j)),
            ],
        ),
        compiler_params=pltpu.CompilerParams(
            dimension_semantics=("parallel", "parallel")),
        cost_estimate=pl.CostEstimate(flops=flops,
                                      transcendentals=N * HW * ctot,
                                      bytes_accessed=bytes_accessed),
    )(x, w_stacked, b_stacked)


def concat_conv1x1_bn_silu(a, b, wa, wb, bias, out_dtype=jnp.bfloat16):
    """cv3(cat([a, b], dim=1)) = silu(wa @ a + wb @ b + bias). bf16 output."""
    N, Ca_in, HW = a.shape
    Cb_in = b.shape[1]
    Cout = wa.shape[0]
    tm = _pick_tile(HW)
    grid = (N, HW // tm)
    out_bytes = jnp.dtype(out_dtype).itemsize
    flops = 2 * N * HW * (Ca_in + Cb_in) * Cout
    bytes_accessed = (a.size + b.size + wa.size + wb.size) * 2 + bias.size * 4 \
        + N * HW * Cout * out_bytes
    return pl.pallas_call(
        _concat_conv1x1_kernel,
        out_shape=jax.ShapeDtypeStruct((N, Cout, HW), out_dtype),
        grid_spec=pltpu.PrefetchScalarGridSpec(
            num_scalar_prefetch=0,
            grid=grid,
            in_specs=[
                pl.BlockSpec((1, Ca_in, tm), lambda n, j: (n, 0, j)),
                pl.BlockSpec((1, Cb_in, tm), lambda n, j: (n, 0, j)),
                pl.BlockSpec((Cout, Ca_in), lambda n, j: (0, 0)),
                pl.BlockSpec((Cout, Cb_in), lambda n, j: (0, 0)),
                pl.BlockSpec((Cout, 1), lambda n, j: (0, 0)),
            ],
            out_specs=pl.BlockSpec((1, Cout, tm), lambda n, j: (n, 0, j)),
        ),
        compiler_params=pltpu.CompilerParams(
            dimension_semantics=("parallel", "parallel")),
        cost_estimate=pl.CostEstimate(flops=flops,
                                      transcendentals=N * HW * Cout,
                                      bytes_accessed=bytes_accessed),
    )(a, b, wa, wb, bias)


def bottleneck_bn_silu(y, bp, H, W, shortcut=False):
    """One Bottleneck: silu(bn(conv3x3(silu(bn(conv1x1(y)))))) [+ y if shortcut].

    y: (N, Cin, H*W) bf16 -> (N, Cout, H*W) bf16.  No wrapper-side padding and
    no post-kernel slicing: the kernel reads and writes the unpadded layout.
    """
    N, Cin, HW = y.shape
    assert HW == H * W
    w1, b1 = _fold_1x1(bp["cv1"])                          # (Cmid, Cin) bf16
    w2, b2 = _fold_3x3(bp["cv2"])                          # (Cout, 9*Cmid) bf16
    Cmid, Cout = w1.shape[0], w2.shape[0]
    if shortcut:
        assert Cin == Cout
    masks = _tap_masks(H, W)                               # (9, 1, HW) f32

    flops = 2 * N * HW * Cin * Cmid + 2 * N * HW * 9 * Cmid * Cout
    bytes_accessed = (y.size + w1.size + w2.size) * 2 \
        + (masks.size + b1.size + b2.size) * 4 + N * Cout * HW * 2

    return pl.pallas_call(
        functools.partial(_bottleneck_kernel, img_w=W, hw=HW, shortcut=shortcut),
        out_shape=jax.ShapeDtypeStruct((N, Cout, HW), jnp.bfloat16),
        grid_spec=pltpu.PrefetchScalarGridSpec(
            num_scalar_prefetch=0,
            grid=(N,),
            in_specs=[
                pl.BlockSpec((1, Cin, HW), lambda n: (n, 0, 0)),
                pl.BlockSpec((9, 1, HW), lambda n: (0, 0, 0)),
                pl.BlockSpec((Cmid, Cin), lambda n: (0, 0)),
                pl.BlockSpec((Cmid, 1), lambda n: (0, 0)),
                pl.BlockSpec((Cout, 9 * Cmid), lambda n: (0, 0)),
                pl.BlockSpec((Cout, 1), lambda n: (0, 0)),
            ],
            out_specs=pl.BlockSpec((1, Cout, HW), lambda n: (n, 0, 0)),
        ),
        compiler_params=pltpu.CompilerParams(
            dimension_semantics=("parallel",),
            vmem_limit_bytes=48 * 1024 * 1024),
        cost_estimate=pl.CostEstimate(flops=flops,
                                      transcendentals=N * HW * (Cmid + Cout),
                                      bytes_accessed=bytes_accessed),
    )(y, masks, w1, b1, w2, b2)


# ----------------------------- C3f forward -----------------------------------


def c3f_forward(x_nchw, params, shortcut=False):
    """Matches C3f.forward: cv3(cat(m(cv1(x)), cv2(x), dim=1)). NCHW in/out."""
    N, C1, H, W = x_nchw.shape
    HW = H * W
    x = x_nchw.reshape(N, C1, HW).astype(jnp.bfloat16)     # pixels on lanes

    w1, b1 = _fold_1x1(params["cv1"])
    w2, b2 = _fold_1x1(params["cv2"])
    ca = w1.shape[0]
    y1, y2 = dual_conv1x1_bn_silu(
        x,
        jnp.concatenate([w1, w2], axis=0),
        jnp.concatenate([b1, b2], axis=0),
        ca,
    )

    for bp in params["m"]:                                 # Bottleneck chain
        y1 = bottleneck_bn_silu(y1, bp, H, W, shortcut=shortcut)

    c_ = y1.shape[1]
    w3, b3 = _fold_1x1(params["cv3"])                      # (C2, 2*c_)
    out = concat_conv1x1_bn_silu(y1, y2, w3[:, :c_], w3[:, c_:], b3)
    return out.reshape(N, -1, H, W)


# ----------------------------- params / reference ----------------------------


def init_conv_bn(key, cin, cout, k):
    kw_, kg, kb, km, kv = jax.random.split(key, 5)
    return dict(
        w=jax.random.normal(kw_, (cout, cin, k, k), jnp.float32) * 0.1,
        gamma=jax.random.uniform(kg, (cout,), jnp.float32, 0.5, 1.5),
        beta=jax.random.normal(kb, (cout,), jnp.float32) * 0.1,
        mean=jax.random.normal(km, (cout,), jnp.float32) * 0.1,
        var=jax.random.uniform(kv, (cout,), jnp.float32, 0.5, 1.5),
    )


def init_c3f_params(key, c1, c2, n=1, e=0.5):
    c_ = int(c2 * e)
    keys = jax.random.split(key, 3 + 2 * n)
    params = dict(
        cv1=init_conv_bn(keys[0], c1, c_, 1),
        cv2=init_conv_bn(keys[1], c1, c_, 1),
        cv3=init_conv_bn(keys[2], 2 * c_, c2, 1),
        m=[],
    )
    for i in range(n):  # Bottleneck(c_, c_, e=1.0)
        params["m"].append(
            dict(
                cv1=init_conv_bn(keys[3 + 2 * i], c_, c_, 1),
                cv2=init_conv_bn(keys[4 + 2 * i], c_, c_, 3),
            )
        )
    return params


def _conv_bn_silu_ref(x_nchw, p, k):
    pad = (k - 1) // 2
    z = jax.lax.conv_general_dilated(
        x_nchw, p["w"], (1, 1), [(pad, pad), (pad, pad)],
        dimension_numbers=("NCHW", "OIHW", "NCHW"))
    scale, bias = _fold_bn(p)
    z = z * scale.reshape(1, -1, 1, 1) + bias.reshape(1, -1, 1, 1)
    return z * jax.nn.sigmoid(z)


def c3f_forward_ref(x, params, shortcut=False):
    y1 = _conv_bn_silu_ref(x, params["cv1"], 1)
    for bp in params["m"]:
        b = _conv_bn_silu_ref(_conv_bn_silu_ref(y1, bp["cv1"], 1), bp["cv2"], 3)
        y1 = y1 + b if shortcut else b
    y2 = _conv_bn_silu_ref(x, params["cv2"], 1)
    return _conv_bn_silu_ref(jnp.concatenate([y1, y2], axis=1), params["cv3"], 1)


# ----------------------------- main -------------------------------------------

if __name__ == "__main__":
    key = jax.random.PRNGKey(0)
    kx, kp = jax.random.split(key)

    N, C1, H, W = 2, 8, 16, 16
    C2, n_blocks = 8, 1                          # c_ = int(C2 * 0.5) = 4
    x = jax.random.normal(kx, (N, C1, H, W), jnp.float32)
    params = init_c3f_params(kp, C1, C2, n=n_blocks, e=0.5)

    fwd = jax.jit(functools.partial(c3f_forward, shortcut=False))
    out = jax.block_until_ready(fwd(x, params))
    assert out.shape == (N, C2, H, W), out.shape

    # Pure-JAX/XLA f32 reference.  Tolerance covers the bf16 MXU operands and
    # the bf16 HBM intermediates / output the kernels use.
    ref = jax.block_until_ready(c3f_forward_ref(x, params, shortcut=False))
    out_f32 = out.astype(jnp.float32)
    err = float(jnp.max(jnp.abs(out_f32 - ref)))
    assert jnp.allclose(out_f32, ref, atol=5e-2, rtol=5e-2), err

    print("KERNEL_OK")
</pallas_src>

<mosaic_0001>
module attributes {stable_mosaic.version = 11 : i64} {
  func.func @_dual_conv1x1_kernel(%arg0: i32, %arg1: i32, %arg2: memref<1x8x256xbf16, #tpu.memory_space<vmem>>, %arg3: memref<8x8xbf16, #tpu.memory_space<vmem>>, %arg4: memref<8x1xf32, #tpu.memory_space<vmem>>, %arg5: memref<1x4x256xbf16, #tpu.memory_space<vmem>>, %arg6: memref<1x4x256xbf16, #tpu.memory_space<vmem>>) attributes {dimension_semantics = [#tpu.dimension_semantics<parallel>, #tpu.dimension_semantics<parallel>], iteration_bounds = array<i64: 2, 1>, scalar_prefetch = 0 : i64, scratch_operands = 0 : i64, tpu.core_type = #tpu.core_type<tc>, window_params = [{transform_indices = @transform_0, window_bounds = array<i64: 1, 8, 256>}, {pipeline_mode = #tpu.pipeline_mode<synchronous>, transform_indices = @transform_1, window_bounds = array<i64: 8, 8>}, {pipeline_mode = #tpu.pipeline_mode<synchronous>, transform_indices = @transform_2, window_bounds = array<i64: 8, 1>}, {transform_indices = @transform_3, window_bounds = array<i64: 1, 4, 256>}, {transform_indices = @transform_4, window_bounds = array<i64: 1, 4, 256>}]} {
    %c0 = arith.constant 0 : index
    %c0_0 = arith.constant 0 : index
    %c0_1 = arith.constant 0 : index
    %0 = vector.load %arg2[%c0, %c0_0, %c0_1] : memref<1x8x256xbf16, #tpu.memory_space<vmem>>, vector<1x8x256xbf16>
    %1 = vector.shape_cast %0 : vector<1x8x256xbf16> to vector<8x256xbf16>
    %c0_2 = arith.constant 0 : index
    %c0_3 = arith.constant 0 : index
    %2 = vector.load %arg3[%c0_2, %c0_3] : memref<8x8xbf16, #tpu.memory_space<vmem>>, vector<8x8xbf16>
    %cst = arith.constant dense<0.000000e+00> : vector<8x256xf32>
    %3 = tpu.matmul %2, %1, %cst {dimension_numbers = #tpu.dot_dimension_numbers<[1], [0], [0], [1], [0, 0, 1, 1], [], []>} : vector<8x8xbf16>, vector<8x256xbf16>, vector<8x256xf32> -> vector<8x256xf32>
    %c0_4 = arith.constant 0 : index
    %c0_5 = arith.constant 0 : index
    %4 = vector.load %arg4[%c0_4, %c0_5] : memref<8x1xf32, #tpu.memory_space<vmem>>, vector<8x1xf32>
    %5 = vector.broadcast %4 : vector<8x1xf32> to vector<8x256xf32>
    %6 = arith.addf %3, %5 : vector<8x256xf32>
    %7 = arith.negf %6 : vector<8x256xf32>
    %8 = math.exp %7 : vector<8x256xf32>
    %cst_6 = arith.constant 1.000000e+00 : f32
    %9 = vector.broadcast %cst_6 : f32 to vector<8x256xf32>
    %10 = arith.addf %9, %8 : vector<8x256xf32>
    %11 = arith.divf %9, %10 : vector<8x256xf32>
    %12 = arith.mulf %6, %11 : vector<8x256xf32>
    %13 = vector.extract_strided_slice %12 {offsets = [0, 0], sizes = [4, 256], strides = [1, 1]} : vector<8x256xf32> to vector<4x256xf32>
    %14 = arith.truncf %13 : vector<4x256xf32> to vector<4x256xbf16>
    %c0_7 = arith.constant 0 : index
    %c0_8 = arith.constant 0 : index
    %c0_9 = arith.constant 0 : index
    %15 = vector.load %arg5[%c0_7, %c0_8, %c0_9] : memref<1x4x256xbf16, #tpu.memory_space<vmem>>, vector<1x4x256xbf16>
    %16 = vector.shape_cast %15 : vector<1x4x256xbf16> to vector<4x256xbf16>
    %17 = vector.shape_cast %14 : vector<4x256xbf16> to vector<1x4x256xbf16>
    tpu.vector_store %arg5[%c0_7, %c0_8, %c0_9], %17 {strides = array<i32>} : memref<1x4x256xbf16, #tpu.memory_space<vmem>>, vector<1x4x256xbf16>,
    %18 = vector.extract_strided_slice %12 {offsets = [4, 0], sizes = [4, 256], strides = [1, 1]} : vector<8x256xf32> to vector<4x256xf32>
    %19 = arith.truncf %18 : vector<4x256xf32> to vector<4x256xbf16>
    %c0_10 = arith.constant 0 : index
    %c0_11 = arith.constant 0 : index
    %c0_12 = arith.constant 0 : index
    %20 = vector.load %arg6[%c0_10, %c0_11, %c0_12] : memref<1x4x256xbf16, #tpu.memory_space<vmem>>, vector<1x4x256xbf16>
    %21 = vector.shape_cast %20 : vector<1x4x256xbf16> to vector<4x256xbf16>
    %22 = vector.shape_cast %19 : vector<4x256xbf16> to vector<1x4x256xbf16>
    tpu.vector_store %arg6[%c0_10, %c0_11, %c0_12], %22 {strides = array<i32>} : memref<1x4x256xbf16, #tpu.memory_space<vmem>>, vector<1x4x256xbf16>,
    return
  }
  func.func @transform_0(%arg0: i32, %arg1: i32) -> (i32, i32, i32) {
    %c0_i32 = arith.constant 0 : i32
    %c0_i32_0 = arith.constant 0 : i32
    return %arg0, %c0_i32, %arg1 : i32, i32, i32
  }
  func.func @transform_1(%arg0: i32, %arg1: i32) -> (i32, i32) {
    %c0_i32 = arith.constant 0 : i32
    %c0_i32_0 = arith.constant 0 : i32
    %c0_i32_1 = arith.constant 0 : i32
    return %c0_i32, %c0_i32_0 : i32, i32
  }
  func.func @transform_2(%arg0: i32, %arg1: i32) -> (i32, i32) {
    %c0_i32 = arith.constant 0 : i32
    %c0_i32_0 = arith.constant 0 : i32
    %c0_i32_1 = arith.constant 0 : i32
    return %c0_i32, %c0_i32_0 : i32, i32
  }
  func.func @transform_3(%arg0: i32, %arg1: i32) -> (i32, i32, i32) {
    %c0_i32 = arith.constant 0 : i32
    %c0_i32_0 = arith.constant 0 : i32
    return %arg0, %c0_i32, %arg1 : i32, i32, i32
  }
  func.func @transform_4(%arg0: i32, %arg1: i32) -> (i32, i32, i32) {
    %c0_i32 = arith.constant 0 : i32
    %c0_i32_0 = arith.constant 0 : i32
    return %arg0, %c0_i32, %arg1 : i32, i32, i32
  }
}

module attributes {stable_mosaic.version = 11 : i64} {
  func.func @_bottleneck_kernel(%arg0: i32, %arg1: memref<1x4x256xbf16, #tpu.memory_space<vmem>>, %arg2: memref<9x1x256xf32, #tpu.memory_space<vmem>>, %arg3: memref<4x4xbf16, #tpu.memory_space<vmem>>, %arg4: memref<4x1xf32, #tpu.memory_space<vmem>>, %arg5: memref<4x36xbf16, #tpu.memory_space<vmem>>, %arg6: memref<4x1xf32, #tpu.memory_space<vmem>>, %arg7: memref<1x4x256xbf16, #tpu.memory_space<vmem>>) attributes {dimension_semantics = [#tpu.dimension_semantics<parallel>], iteration_bounds = array<i64: 2>, scalar_prefetch = 0 : i64, scratch_operands = 0 : i64, tpu.core_type = #tpu.core_type<tc>, window_params = [{transform_indices = @transform_0, window_bounds = array<i64: 1, 4, 256>}, {pipeline_mode = #tpu.pipeline_mode<synchronous>, transform_indices = @transform_1, window_bounds = array<i64: 9, 1, 256>}, {pipeline_mode = #tpu.pipeline_mode<synchronous>, transform_indices = @transform_2, window_bounds = array<i64: 4, 4>}, {pipeline_mode = #tpu.pipeline_mode<synchronous>, transform_indices = @transform_3, window_bounds = array<i64: 4, 1>}, {pipeline_mode = #tpu.pipeline_mode<synchronous>, transform_indices = @transform_4, window_bounds = array<i64: 4, 36>}, {pipeline_mode = #tpu.pipeline_mode<synchronous>, transform_indices = @transform_5, window_bounds = array<i64: 4, 1>}, {transform_indices = @transform_6, window_bounds = array<i64: 1, 4, 256>}]} {
    %c0 = arith.constant 0 : index
    %c0_0 = arith.constant 0 : index
    %c0_1 = arith.constant 0 : index
    %0 = vector.load %arg1[%c0, %c0_0, %c0_1] : memref<1x4x256xbf16, #tpu.memory_space<vmem>>, vector<1x4x256xbf16>
    %1 = vector.shape_cast %0 : vector<1x4x256xbf16> to vector<4x256xbf16>
    %c0_2 = arith.constant 0 : index
    %c0_3 = arith.constant 0 : index
    %2 = vector.load %arg3[%c0_2, %c0_3] : memref<4x4xbf16, #tpu.memory_space<vmem>>, vector<4x4xbf16>
    %cst = arith.constant dense<0.000000e+00> : vector<4x256xf32>
    %3 = tpu.matmul %2, %1, %cst {dimension_numbers = #tpu.dot_dimension_numbers<[1], [0], [0], [1], [0, 0, 1, 1], [], []>} : vector<4x4xbf16>, vector<4x256xbf16>, vector<4x256xf32> -> vector<4x256xf32>
    %c0_4 = arith.constant 0 : index
    %c0_5 = arith.constant 0 : index
    %4 = vector.load %arg4[%c0_4, %c0_5] : memref<4x1xf32, #tpu.memory_space<vmem>>, vector<4x1xf32>
    %5 = vector.broadcast %4 : vector<4x1xf32> to vector<4x256xf32>
    %6 = arith.addf %3, %5 : vector<4x256xf32>
    %7 = arith.negf %6 : vector<4x256xf32>
    %8 = math.exp %7 : vector<4x256xf32>
    %cst_6 = arith.constant 1.000000e+00 : f32
    %9 = vector.broadcast %cst_6 : f32 to vector<4x256xf32>
    %10 = arith.addf %9, %8 : vector<4x256xf32>
    %11 = arith.divf %9, %10 : vector<4x256xf32>
    %12 = arith.mulf %6, %11 : vector<4x256xf32>
    %c0_7 = arith.constant 0 : index
    %c0_8 = arith.constant 0 : index
    %c0_9 = arith.constant 0 : index
    %13 = vector.load %arg2[%c0_7, %c0_8, %c0_9] : memref<9x1x256xf32, #tpu.memory_space<vmem>>, vector<9x1x256xf32>
    %c17_i32 = arith.constant 17 : i32
    %14 = tpu.dynamic_rotate %12 by %c17_i32 dim 1 : vector<4x256xf32>, i32 -> vector<4x256xf32>
    %15 = vector.extract_strided_slice %13 {offsets = [0, 0, 0], sizes = [1, 1, 256], strides = [1, 1, 1]} : vector<9x1x256xf32> to vector<1x1x256xf32>
    %16 = vector.shape_cast %15 : vector<1x1x256xf32> to vector<1x256xf32>
    %17 = vector.broadcast %16 : vector<1x256xf32> to vector<4x256xf32>
    %18 = arith.mulf %14, %17 : vector<4x256xf32>
    %c16_i32 = arith.constant 16 : i32
    %19 = tpu.dynamic_rotate %12 by %c16_i32 dim 1 : vector<4x256xf32>, i32 -> vector<4x256xf32>
    %20 = vector.extract_strided_slice %13 {offsets = [1, 0, 0], sizes = [1, 1, 256], strides = [1, 1, 1]} : vector<9x1x256xf32> to vector<1x1x256xf32>
    %21 = vector.shape_cast %20 : vector<1x1x256xf32> to vector<1x256xf32>
    %22 = vector.broadcast %21 : vector<1x256xf32> to vector<4x256xf32>
    %23 = arith.mulf %19, %22 : vector<4x256xf32>
    %c15_i32 = arith.constant 15 : i32
    %24 = tpu.dynamic_rotate %12 by %c15_i32 dim 1 : vector<4x256xf32>, i32 -> vector<4x256xf32>
    %25 = vector.extract_strided_slice %13 {offsets = [2, 0, 0], sizes = [1, 1, 256], strides = [1, 1, 1]} : vector<9x1x256xf32> to vector<1x1x256xf32>
    %26 = vector.shape_cast %25 : vector<1x1x256xf32> to vector<1x256xf32>
    %27 = vector.broadcast %26 : vector<1x256xf32> to vector<4x256xf32>
    %28 = arith.mulf %24, %27 : vector<4x256xf32>
    %c1_i32 = arith.constant 1 : i32
    %29 = tpu.dynamic_rotate %12 by %c1_i32 dim 1 : vector<4x256xf32>, i32 -> vector<4x256xf32>
    %30 = vector.extract_strided_slice %13 {offsets = [3, 0, 0], sizes = [1, 1, 256], strides = [1, 1, 1]} : vector<9x1x256xf32> to vector<1x1x256xf32>
    %31 = vector.shape_cast %30 : vector<1x1x256xf32> to vector<1x256xf32>
    %32 = vector.broadcast %31 : vector<1x256xf32> to vector<4x256xf32>
    %33 = arith.mulf %29, %32 : vector<4x256xf32>
    %34 = vector.extract_strided_slice %13 {offsets = [4, 0, 0], sizes = [1, 1, 256], strides = [1, 1, 1]} : vector<9x1x256xf32> to vector<1x1x256xf32>
    %35 = vector.shape_cast %34 : vector<1x1x256xf32> to vector<1x256xf32>
    %36 = vector.broadcast %35 : vector<1x256xf32> to vector<4x256xf32>
    %37 = arith.mulf %12, %36 : vector<4x256xf32>
    %c255_i32 = arith.constant 255 : i32
    %38 = tpu.dynamic_rotate %12 by %c255_i32 dim 1 : vector<4x256xf32>, i32 -> vector<4x256xf32>
    %39 = vector.extract_strided_slice %13 {offsets = [5, 0, 0], sizes = [1, 1, 256], strides = [1, 1, 1]} : vector<9x1x256xf32> to vector<1x1x256xf32>
    %40 = vector.shape_cast %39 : vector<1x1x256xf32> to vector<1x256xf32>
    %41 = vector.broadcast %40 : vector<1x256xf32> to vector<4x256xf32>
    %42 = arith.mulf %38, %41 : vector<4x256xf32>
    %c241_i32 = arith.constant 241 : i32
    %43 = tpu.dynamic_rotate %12 by %c241_i32 dim 1 : vector<4x256xf32>, i32 -> vector<4x256xf32>
    %44 = vector.extract_strided_slice %13 {offsets = [6, 0, 0], sizes = [1, 1, 256], strides = [1, 1, 1]} : vector<9x1x256xf32> to vector<1x1x256xf32>
    %45 = vector.shape_cast %44 : vector<1x1x256xf32> to vector<1x256xf32>
    %46 = vector.broadcast %45 : vector<1x256xf32> to vector<4x256xf32>
    %47 = arith.mulf %43, %46 : vector<4x256xf32>
    %c240_i32 = arith.constant 240 : i32
    %48 = tpu.dynamic_rotate %12 by %c240_i32 dim 1 : vector<4x256xf32>, i32 -> vector<4x256xf32>
    %49 = vector.extract_strided_slice %13 {offsets = [7, 0, 0], sizes = [1, 1, 256], strides = [1, 1, 1]} : vector<9x1x256xf32> to vector<1x1x256xf32>
    %50 = vector.shape_cast %49 : vector<1x1x256xf32> to vector<1x256xf32>
    %51 = vector.broadcast %50 : vector<1x256xf32> to vector<4x256xf32>
    %52 = arith.mulf %48, %51 : vector<4x256xf32>
    %c239_i32 = arith.constant 239 : i32
    %53 = tpu.dynamic_rotate %12 by %c239_i32 dim 1 : vector<4x256xf32>, i32 -> vector<4x256xf32>
    %54 = vector.extract_strided_slice %13 {offsets = [8, 0, 0], sizes = [1, 1, 256], strides = [1, 1, 1]} : vector<9x1x256xf32> to vector<1x1x256xf32>
    %55 = vector.shape_cast %54 : vector<1x1x256xf32> to vector<1x256xf32>
    %56 = vector.broadcast %55 : vector<1x256xf32> to vector<4x256xf32>
    %57 = arith.mulf %53, %56 : vector<4x256xf32>
    %58 = tpu.concatenate %18, %23, %28, %33, %37, %42, %47, %52, %57 in 0 : vector<4x256xf32>, vector<4x256xf32>, vector<4x256xf32>, vector<4x256xf32>, vector<4x256xf32>, vector<4x256xf32>, vector<4x256xf32>, vector<4x256xf32>, vector<4x256xf32> -> vector<36x256xf32>
    %59 = arith.truncf %58 : vector<36x256xf32> to vector<36x256xbf16>
    %c0_10 = arith.constant 0 : index
    %c0_11 = arith.constant 0 : index
    %60 = vector.load %arg5[%c0_10, %c0_11] : memref<4x36xbf16, #tpu.memory_space<vmem>>, vector<4x36xbf16>
    %cst_12 = arith.constant dense<0.000000e+00> : vector<4x256xf32>
    %61 = tpu.matmul %60, %59, %cst_12 {dimension_numbers = #tpu.dot_dimension_numbers<[1], [0], [0], [1], [0, 0, 1, 1], [], []>} : vector<4x36xbf16>, vector<36x256xbf16>, vector<4x256xf32> -> vector<4x256xf32>
    %c0_13 = arith.constant 0 : index
    %c0_14 = arith.constant 0 : index
    %62 = vector.load %arg6[%c0_13, %c0_14] : memref<4x1xf32, #tpu.memory_space<vmem>>, vector<4x1xf32>
    %63 = vector.broadcast %62 : vector<4x1xf32> to vector<4x256xf32>
    %64 = arith.addf %61, %63 : vector<4x256xf32>
    %65 = arith.negf %64 : vector<4x256xf32>
    %66 = math.exp %65 : vector<4x256xf32>
    %cst_15 = arith.constant 1.000000e+00 : f32
    %67 = vector.broadcast %cst_15 : f32 to vector<4x256xf32>
    %68 = arith.addf %67, %66 : vector<4x256xf32>
    %69 = arith.divf %67, %68 : vector<4x256xf32>
    %70 = arith.mulf %64, %69 : vector<4x256xf32>
    %71 = arith.truncf %70 : vector<4x256xf32> to vector<4x256xbf16>
    %c0_16 = arith.constant 0 : index
    %c0_17 = arith.constant 0 : index
    %c0_18 = arith.constant 0 : index
    %72 = vector.load %arg7[%c0_16, %c0_17, %c0_18] : memref<1x4x256xbf16, #tpu.memory_space<vmem>>, vector<1x4x256xbf16>
    %73 = vector.shape_cast %72 : vector<1x4x256xbf16> to vector<4x256xbf16>
    %74 = vector.shape_cast %71 : vector<4x256xbf16> to vector<1x4x256xbf16>
    tpu.vector_store %arg7[%c0_16, %c0_17, %c0_18], %74 {strides = array<i32>} : memref<1x4x256xbf16, #tpu.memory_space<vmem>>, vector<1x4x256xbf16>,
    return
  }
  func.func @transform_0(%arg0: i32) -> (i32, i32, i32) {
    %c0_i32 = arith.constant 0 : i32
    %c0_i32_0 = arith.constant 0 : i32
    %c0_i32_1 = arith.constant 0 : i32
    return %arg0, %c0_i32, %c0_i32_0 : i32, i32, i32
  }
  func.func @transform_1(%arg0: i32) -> (i32, i32, i32) {
    %c0_i32 = arith.constant 0 : i32
    %c0_i32_0 = arith.constant 0 : i32
    %c0_i32_1 = arith.constant 0 : i32
    %c0_i32_2 = arith.constant 0 : i32
    return %c0_i32, %c0_i32_0, %c0_i32_1 : i32, i32, i32
  }
  func.func @transform_2(%arg0: i32) -> (i32, i32) {
    %c0_i32 = arith.constant 0 : i32
    %c0_i32_0 = arith.constant 0 : i32
    %c0_i32_1 = arith.constant 0 : i32
    return %c0_i32, %c0_i32_0 : i32, i32
  }
  func.func @transform_3(%arg0: i32) -> (i32, i32) {
    %c0_i32 = arith.constant 0 : i32
    %c0_i32_0 = arith.constant 0 : i32
    %c0_i32_1 = arith.constant 0 : i32
    return %c0_i32, %c0_i32_0 : i32, i32
  }
  func.func @transform_4(%arg0: i32) -> (i32, i32) {
    %c0_i32 = arith.constant 0 : i32
    %c0_i32_0 = arith.constant 0 : i32
    %c0_i32_1 = arith.constant 0 : i32
    return %c0_i32, %c0_i32_0 : i32, i32
  }
  func.func @transform_5(%arg0: i32) -> (i32, i32) {
    %c0_i32 = arith.constant 0 : i32
    %c0_i32_0 = arith.constant 0 : i32
    %c0_i32_1 = arith.constant 0 : i32
    return %c0_i32, %c0_i32_0 : i32, i32
  }
  func.func @transform_6(%arg0: i32) -> (i32, i32, i32) {
    %c0_i32 = arith.constant 0 : i32
    %c0_i32_0 = arith.constant 0 : i32
    %c0_i32_1 = arith.constant 0 : i32
    return %arg0, %c0_i32, %c0_i32_0 : i32, i32, i32
  }
}

module attributes {stable_mosaic.version = 11 : i64} {
  func.func @_concat_conv1x1_kernel(%arg0: i32, %arg1: i32, %arg2: memref<1x4x256xbf16, #tpu.memory_space<vmem>>, %arg3: memref<1x4x256xbf16, #tpu.memory_space<vmem>>, %arg4: memref<8x4xbf16, #tpu.memory_space<vmem>>, %arg5: memref<8x4xbf16, #tpu.memory_space<vmem>>, %arg6: memref<8x1xf32, #tpu.memory_space<vmem>>, %arg7: memref<1x8x256xbf16, #tpu.memory_space<vmem>>) attributes {dimension_semantics = [#tpu.dimension_semantics<parallel>, #tpu.dimension_semantics<parallel>], iteration_bounds = array<i64: 2, 1>, scalar_prefetch = 0 : i64, scratch_operands = 0 : i64, tpu.core_type = #tpu.core_type<tc>, window_params = [{transform_indices = @transform_0, window_bounds = array<i64: 1, 4, 256>}, {transform_indices = @transform_1, window_bounds = array<i64: 1, 4, 256>}, {pipeline_mode = #tpu.pipeline_mode<synchronous>, transform_indices = @transform_2, window_bounds = array<i64: 8, 4>}, {pipeline_mode = #tpu.pipeline_mode<synchronous>, transform_indices = @transform_3, window_bounds = array<i64: 8, 4>}, {pipeline_mode = #tpu.pipeline_mode<synchronous>, transform_indices = @transform_4, window_bounds = array<i64: 8, 1>}, {transform_indices = @transform_5, window_bounds = array<i64: 1, 8, 256>}]} {
    %c0 = arith.constant 0 : index
    %c0_0 = arith.constant 0 : index
    %0 = vector.load %arg4[%c0, %c0_0] : memref<8x4xbf16, #tpu.memory_space<vmem>>, vector<8x4xbf16>
    %c0_1 = arith.constant 0 : index
    %c0_2 = arith.constant 0 : index
    %c0_3 = arith.constant 0 : index
    %1 = vector.load %arg2[%c0_1, %c0_2, %c0_3] : memref<1x4x256xbf16, #tpu.memory_space<vmem>>, vector<1x4x256xbf16>
    %2 = vector.shape_cast %1 : vector<1x4x256xbf16> to vector<4x256xbf16>
    %cst = arith.constant dense<0.000000e+00> : vector<8x256xf32>
    %3 = tpu.matmul %0, %2, %cst {dimension_numbers = #tpu.dot_dimension_numbers<[1], [0], [0], [1], [0, 0, 1, 1], [], []>} : vector<8x4xbf16>, vector<4x256xbf16>, vector<8x256xf32> -> vector<8x256xf32>
    %c0_4 = arith.constant 0 : index
    %c0_5 = arith.constant 0 : index
    %4 = vector.load %arg5[%c0_4, %c0_5] : memref<8x4xbf16, #tpu.memory_space<vmem>>, vector<8x4xbf16>
    %c0_6 = arith.constant 0 : index
    %c0_7 = arith.constant 0 : index
    %c0_8 = arith.constant 0 : index
    %5 = vector.load %arg3[%c0_6, %c0_7, %c0_8] : memref<1x4x256xbf16, #tpu.memory_space<vmem>>, vector<1x4x256xbf16>
    %6 = vector.shape_cast %5 : vector<1x4x256xbf16> to vector<4x256xbf16>
    %cst_9 = arith.constant dense<0.000000e+00> : vector<8x256xf32>
    %7 = tpu.matmul %4, %6, %cst_9 {dimension_numbers = #tpu.dot_dimension_numbers<[1], [0], [0], [1], [0, 0, 1, 1], [], []>} : vector<8x4xbf16>, vector<4x256xbf16>, vector<8x256xf32> -> vector<8x256xf32>
    %8 = arith.addf %3, %7 : vector<8x256xf32>
    %c0_10 = arith.constant 0 : index
    %c0_11 = arith.constant 0 : index
    %9 = vector.load %arg6[%c0_10, %c0_11] : memref<8x1xf32, #tpu.memory_space<vmem>>, vector<8x1xf32>
    %10 = vector.broadcast %9 : vector<8x1xf32> to vector<8x256xf32>
    %11 = arith.addf %8, %10 : vector<8x256xf32>
    %12 = arith.negf %11 : vector<8x256xf32>
    %13 = math.exp %12 : vector<8x256xf32>
    %cst_12 = arith.constant 1.000000e+00 : f32
    %14 = vector.broadcast %cst_12 : f32 to vector<8x256xf32>
    %15 = arith.addf %14, %13 : vector<8x256xf32>
    %16 = arith.divf %14, %15 : vector<8x256xf32>
    %17 = arith.mulf %11, %16 : vector<8x256xf32>
    %18 = arith.truncf %17 : vector<8x256xf32> to vector<8x256xbf16>
    %c0_13 = arith.constant 0 : index
    %c0_14 = arith.constant 0 : index
    %c0_15 = arith.constant 0 : index
    %19 = vector.load %arg7[%c0_13, %c0_14, %c0_15] : memref<1x8x256xbf16, #tpu.memory_space<vmem>>, vector<1x8x256xbf16>
    %20 = vector.shape_cast %19 : vector<1x8x256xbf16> to vector<8x256xbf16>
    %21 = vector.shape_cast %18 : vector<8x256xbf16> to vector<1x8x256xbf16>
    tpu.vector_store %arg7[%c0_13, %c0_14, %c0_15], %21 {strides = array<i32>} : memref<1x8x256xbf16, #tpu.memory_space<vmem>>, vector<1x8x256xbf16>,
    return
  }
  func.func @transform_0(%arg0: i32, %arg1: i32) -> (i32, i32, i32) {
    %c0_i32 = arith.constant 0 : i32
    %c0_i32_0 = arith.constant 0 : i32
    return %arg0, %c0_i32, %arg1 : i32, i32, i32
  }
  func.func @transform_1(%arg0: i32, %arg1: i32) -> (i32, i32, i32) {
    %c0_i32 = arith.constant 0 : i32
    %c0_i32_0 = arith.constant 0 : i32
    return %arg0, %c0_i32, %arg1 : i32, i32, i32
  }
  func.func @transform_2(%arg0: i32, %arg1: i32) -> (i32, i32) {
    %c0_i32 = arith.constant 0 : i32
    %c0_i32_0 = arith.constant 0 : i32
    %c0_i32_1 = arith.constant 0 : i32
    return %c0_i32, %c0_i32_0 : i32, i32
  }
  func.func @transform_3(%arg0: i32, %arg1: i32) -> (i32, i32) {
    %c0_i32 = arith.constant 0 : i32
    %c0_i32_0 = arith.constant 0 : i32
    %c0_i32_1 = arith.constant 0 : i32
    return %c0_i32, %c0_i32_0 : i32, i32
  }
  func.func @transform_4(%arg0: i32, %arg1: i32) -> (i32, i32) {
    %c0_i32 = arith.constant 0 : i32
    %c0_i32_0 = arith.constant 0 : i32
    %c0_i32_1 = arith.constant 0 : i32
    return %c0_i32, %c0_i32_0 : i32, i32
  }
  func.func @transform_5(%arg0: i32, %arg1: i32) -> (i32, i32, i32) {
    %c0_i32 = arith.constant 0 : i32
    %c0_i32_0 = arith.constant 0 : i32
    return %arg0, %c0_i32, %arg1 : i32, i32, i32
  }
}

</mosaic_0001>

<bundles_post_ra>
// kernel: c3f_forward.3
= control target key start
LH: loop header
LB: loop body
LE: loop exit
PB: predicated region body
PF: predicated region fallthrough
CT: control target
= control target key end

     0   :  { %s607_s15 = smov 0   ;;  %s609_s16 = smov 0   ;;  %s653_s0 = inlined_call_operand.vmem [shape: bf16[2,8,256], index: 0, kind: input, shape index: {}]   ;;  %s654_s1 = inlined_call_operand.vmem [shape: bf16[8,8], index: 1, kind: input, shape index: {}]   ;;  %s655_s2 = inlined_call_operand.vmem [shape: f32[8,1], index: 2, kind: input, shape index: {}]   ;;  %s656_s3 = inlined_call_operand.vmem [shape: bf16[2,4,256], index: 3, kind: output, shape index: {0}]   ;;  %s657_s4 = inlined_call_operand.vmem [shape: bf16[2,4,256], index: 4, kind: output, shape index: {1}]  }
   0x1   :  { %s611_s17 = smov 0  }
   0x2 LB: > { %s27_s18 = sadd.s32 1, %s574_s16  ;;  %p499_p0 = scmp.ge.s32.totalorder %s578_s17, 1  ;;  %s578_s17 = sphi %s611_s17, %s15_s17   ;;  %s574_s16 = sphi %s609_s16, %s659_s16   ;;  %s570_s15 = sphi %s607_s15, %s658_s15  }
   0x3   : > { %p29_p1 = scmp.ge.s32.totalorder %s27_s18, 2  ;;  %p188_p2 = scmp.lt.s32.totalorder %s578_s17, 3 }
   0x5   : > { %s661_s18 = smov (%p29_p1, %s27_s18), 0  ;;  %p189_p3 = pnand %p499_p0, %p188_p2 }
   0x6   : > { %p232_p4 = scmp.lt.s32.totalorder (!%p189_p3), %s570_s15, 1  ;;  %v580_v0 = vmov (!%p189_p3), 0   ;;  %v264_v1 = vld [vmem:[%s655_s2] sm:$0xff] (!%p189_p3)  ;;  %vm279_vm0 = vcmask (!%p189_p3), 1043456   ;;  %vm275_vm1 = vcmask (!%p189_p3), 64512   ;;  %v349_v22 = vlaneseq (!%p189_p3) }
   0x7   : > { %192 = sbr.rel (%p189_p3) target bundleno = 274 (0x112), region = 32  ;;  %318 = vmatprep.mubr.bf16.mxu0 (!%p189_p3), %v580_v0  ;;  %545 = vset.pattern.permute.xlu0 (!%p189_p3), %v580_v0  ;;  %v263_v6 = vld [vmem:[%s654_s1] sm:$0xf] (!%p189_p3)  ;;  %v581_v20 = vmov (!%p189_p3), 1983009808  }
   0x8   : > { %267 = vperm.xlu0 (!%p189_p3), %545, %v264_v1   ;;  %v347_v21 = vunpack.c.l.s4 (!%p189_p3), %v581_v20  ;;  %v350_v24 = vshrl.u32 (!%p189_p3), %v349_v22, 7 }
   0xa   : > { %v348_v23 = vunpack.c.0.s8 (!%p189_p3), %v347_v21 }
   0xc   : > { %v351_v29 = vsub.s32 (!%p189_p3), %v348_v23, %v350_v24 }
   0xe   : > { %s663_s15 = smov (!%p232_p4, %s570_s15), 1 }
   0xf   : > { %s516_s21 = sshll.u32 %s663_s15, 3  ;;  %s517_s27 = sshll.u32 %s663_s15, 2 }
  0x10   : > { %s239_s24 = scalar_lea.vmem %s653_s0, %s516_s21  ;;  %s249_s30 = scalar_lea.vmem %s656_s3, %s517_s27 }
  0x11   : > { %v262_v2 = vld [vmem:[%s239_s24] sm:$0xff]  ;;  %s259_s7 = scalar_lea.vmem %s657_s4, %s517_s27 }
  0x12   : > { %v507_v3 = vcombine.high %v262_v2, %v262_v2  ;;  %v506_v4 = vcombine.low %v262_v2, %v262_v2 }
  0x14   : > { %508 = vmatprep.subr.msk.bf16.mxu0 %vm279_vm0, %v507_v3  ;;  %v281_v5 = vsel %vm279_vm0, %v506_v4, 0 }
  0x15   : > { %287 = vmatpush1.bf16.msra.mxu0 %v281_v5 }
  0x18   : > { %509 = vmatmul.mubr.msk.bf16.vlgmr.msra.gmra.mrb[0].mxu0 %vm275_vm1, %v263_v6 }
  0x87   : > { %v268_v7 = vpop.permute.xlu0 %267 }
  0xeb   : > { %v320_v8 = vpop.f32.mrb[0].mxu0 }
  0xec   : > { %v321_v9 = vadd.f32 %v320_v8, %v268_v7  ;;  %v322_v10 = vpop.f32.mrb[1].mxu0 }
  0xed   : > { %v323_v11 = vadd.f32 %v322_v10, %v268_v7  ;;  %v324_v12 = vpop.f32.mrb[2].mxu0 }
  0xee   : > { %v510_v13 = vmul.f32 -1.442695, %v321_v9  ;;  %v325_v14 = vpop.f32.mrb[3].mxu0 }
  0xef   : > { %v511_v15 = vmul.f32 -1.442695, %v323_v11 }
  0xf0   : > { %548 = vpow2.f32 %v510_v13 }
  0xf1   : > { %550 = vpow2.f32 %v511_v15 }
  0xfa   : > { %v549_v16 = vpop.eup %548 }
  0xfb   : > { %v551_v17 = vpop.eup %550  ;;  %v333_v18 = vadd.f32 1.0, %v549_v16 }
  0xfc   : > { %v334_v19 = vadd.f32 1.0, %v551_v17 }
  0xfd   : > { %552 = vrcp.f32 %v333_v18 }
  0xfe   : > { %554 = vrcp.f32 %v334_v19 }
 0x107   : > { %v553_v25 = vpop.eup %552 }
 0x108   : > { %v555_v26 = vpop.eup %554  ;;  %v339_v27 = vmul.f32 %v553_v25, %v321_v9 }
 0x109   : > { %v340_v28 = vmul.f32 %v555_v26, %v323_v11 }
 0x10b   : > { %v512_v30 = vpack.c.bf16 %v340_v28, %v339_v27 }
 0x10d   : > { %v352_v31 = vrot.slane %v512_v30, %v351_v29  ;;  %513 = vst.sshfl [vmem:[%s249_s30] sm:$0x33 pattern:$0x76325410] %v512_v30 }
 0x10f   : > { %v355_v32 = vcombine.high %v352_v31, %v352_v31 }
 0x111   : > { %357 = vst [vmem:[%s259_s7] sm:$0xf] %v355_v32 }
 0x112 PF: > { %s15_s17 = sadd.s32 1, %s578_s17   ;;  %s658_s15 = smov %s574_s16 }
 0x113   : > { %p12_p5 = scmp.ge.s32.totalorder %s15_s17, 4   ;;  %s659_s16 = smov %s661_s18 }
 0x115   :  { %14 = sbr.rel (!%p12_p5) target bundleno = 2 (0x2), region = 74 }

// kernel: c3f_forward.4
= control target key start
LH: loop header
LB: loop body
LE: loop exit
PB: predicated region body
PF: predicated region fallthrough
CT: control target
= control target key end

     0   :  { %s811_s21 = smov 0   ;;  %s978_s0 = inlined_call_operand.vmem [shape: bf16[2,4,256], index: 0, kind: input, shape index: {}]   ;;  %s979_s1 = inlined_call_operand.vmem [shape: f32[9,1,256], index: 1, kind: input, shape index: {}]   ;;  %s980_s2 = inlined_call_operand.vmem [shape: bf16[4,4], index: 2, kind: input, shape index: {}]   ;;  %s981_s3 = inlined_call_operand.vmem [shape: f32[4,1], index: 3, kind: input, shape index: {}]   ;;  %s982_s4 = inlined_call_operand.vmem [shape: bf16[4,36], index: 4, kind: input, shape index: {}]   ;;  %s983_s5 = inlined_call_operand.vmem [shape: f32[4,1], index: 5, kind: input, shape index: {}]   ;;  %s984_s6 = inlined_call_operand.vmem [shape: bf16[2,4,256], index: 6, kind: output, shape index: {}]  }
   0x1 LB: > { %s700_s22 = sadd.s32 4294967295, %s765_s21   ;;  %p704_p0 = scmp.ge.s32.totalorder %s765_s21, 1  ;;  %s765_s21 = sphi %s811_s21, %s16_s21  }
   0x2   : > { %p212_p1 = scmp.lt.s32.totalorder %s765_s21, 3 }
   0x4   : > { %p213_p2 = pnand %p704_p0, %p212_p1 }
   0x5   : > { %p242_p3 = scmp.lt.s32.totalorder (!%p213_p2), %s700_s22, 1  ;;  %v767_v0 = vmov (!%p213_p2), 0   ;;  %v255_v1 = vld [vmem:[%s981_s3] sm:$0xf] (!%p213_p2)  ;;  %vm274_vm0 = vcmask (!%p213_p2), 1041408   ;;  %vm270_vm1 = vcmask (!%p213_p2), 31744   ;;  %v349_v24 = vlaneseq (!%p213_p2) }
   0x6   : > { %216 = sbr.rel (%p213_p2) target bundleno = 664 (0x298), region = 44  ;;  %313 = vmatprep.mubr.bf16.mxu0 (!%p213_p2), %v767_v0  ;;  %741 = vset.pattern.permute.xlu0 (!%p213_p2), %v767_v0  ;;  %v254_v5 = vld [vmem:[%s980_s2] sm:$0x3] (!%p213_p2)  ;;  %s768_s7 = smov (!%p213_p2), 1   ;;  %v339_v33 = vld [vmem:[%s979_s1 + $0x6] sm:$0x3] (!%p213_p2) }
   0x7   : > { %258 = vperm.xlu0 (!%p213_p2), %741, %v255_v1   ;;  %608 = vmatprep.mubr.bf16.mxu1 (!%p213_p2), %v767_v0  ;;  %s769_s8 = smov (!%p213_p2), 16   ;;  %s770_s9 = smov (!%p213_p2), 17   ;;  %v560_v23 = vld [vmem:[%s983_s5] sm:$0xf] (!%p213_p2)  ;;  %v356_v27 = vshrl.u32 (!%p213_p2), %v349_v24, 7  ;;  %v858_v30 = vand.u32 (!%p213_p2), 127, %v349_v24 }
   0x8   : > { %742 = vset.pattern.permute.xlu1 (!%p213_p2), %v767_v0  ;;  %s771_s10 = smov (!%p213_p2), 15   ;;  %s772_s11 = smov (!%p213_p2), 127   ;;  %v870_v34 = vld [vmem:[%s979_s1 + $0x8] sm:$0x3] (!%p213_p2)  ;;  %v336_v35 = vld [vmem:[%s979_s1] sm:$0x3] (!%p213_p2) }
   0x9   : > { %s773_s12 = smov (!%p213_p2), 112   ;;  %s774_s13 = smov (!%p213_p2), 113   ;;  %v860_v31 = vsub.s32 (!%p213_p2), 0, %v356_v27  ;;  %v862_v32 = vsub.s32 (!%p213_p2), 1, %v356_v27  ;;  %v338_v38 = vld [vmem:[%s979_s1 + $0x4] sm:$0x3] (!%p213_p2) }
   0xa   : > { %s775_s14 = smov (!%p213_p2), 111   ;;  %vm411_vm2 = vcmp.lt.s32.totalorder (!%p213_p2), %v858_v30, 1  ;;  %v337_v40 = vld [vmem:[%s979_s1 + $0x2] sm:$0x3] (!%p213_p2)  ;;  %vm351_vm3 = vcmp.lt.s32.totalorder (!%p213_p2), %v858_v30, 17  ;;  %vm391_vm4 = vcmp.lt.s32.totalorder (!%p213_p2), %v858_v30, 15 }
   0xb   : > { %v418_v39 = vrot.slane (!%p213_p2), %v339_v33, %v860_v31  ;;  %v435_v41 = vrot.slane (!%p213_p2), %v870_v34, %v862_v32  ;;  %v431_v42 = vrot.slane (!%p213_p2), %v870_v34, %v860_v31  ;;  %v422_v43 = vrot.slane (!%p213_p2), %v339_v33, %v862_v32  ;;  %v341_v48 = vld [vmem:[%s979_s1 + $0xa] sm:$0x3] (!%p213_p2)  ;;  %v343_v49 = vld [vmem:[%s979_s1 + $0xe] sm:$0x3] (!%p213_p2)  ;;  %v342_v0 = vld [vmem:[%s979_s1 + $0xc] sm:$0x3] (!%p213_p2) }
   0xc   : > { %v358_v44 = vrot.slane (!%p213_p2), %v336_v35, %v860_v31  ;;  %v362_v45 = vrot.slane (!%p213_p2), %v336_v35, %v862_v32  ;;  %v398_v46 = vrot.slane (!%p213_p2), %v338_v38, %v860_v31  ;;  %v402_v47 = vrot.slane (!%p213_p2), %v338_v38, %v862_v32 }
   0xd   : > { %s986_s22 = smov (!%p242_p3, %s700_s22), 1  ;;  %vm371_vm5 = vcmp.lt.s32.totalorder %v858_v30, 16  ;;  %v378_v54 = vrot.slane %v337_v40, %v860_v31  ;;  %v382_v55 = vrot.slane %v337_v40, %v862_v32  ;;  %vm444_vm6 = vcmp.lt.s32.totalorder %v858_v30, 127 }
   0xe   : > { %s722_s25 = sshll.u32 %s986_s22, 2  ;;  %vm544_vm7 = vcmask 1043456   ;;  %v451_v58 = vrot.slane %v341_v48, %v860_v31  ;;  %v455_v59 = vrot.slane %v341_v48, %v862_v32  ;;  %vm484_vm8 = vcmp.lt.s32.totalorder %v858_v30, 112 }
   0xf   : > { %s246_s28 = scalar_lea.vmem %s978_s0, %s722_s25  ;;  %v491_v60 = vrot.slane %v343_v49, %v860_v31  ;;  %v495_v63 = vrot.slane %v343_v49, %v862_v32  ;;  %vm464_vm9 = vcmp.lt.s32.totalorder %v858_v30, 113  ;;  %vm504_vm10 = vcmp.lt.s32.totalorder %v858_v30, 111  ;;  %s251_s18 = scalar_lea.vmem %s984_s6, %s722_s25 }
  0x10   : > { %v709_v2 = vld.sshfl [vmem:[%s246_s28] sm:$0x33 pattern:$0x76325410]  ;;  %vm566_vm11 = vcmask 293888  }
  0x11   : > { %v269_v3 = vcombine.high %v709_v2, %v709_v2  ;;  %v276_v4 = vsel %vm274_vm0, %v709_v2, 0 }
  0x13   : > { %710 = vmatprep.subr.msk.bf16.mxu0 %vm274_vm0, %v269_v3 }
  0x14   : > { %282 = vmatpush1.bf16.msra.mxu0 %v276_v4 }
  0x17   : > { %711 = vmatmul.mubr.msk.bf16.vlgmr.msra.gmra.mrb[0].mxu0 %vm270_vm1, %v254_v5 }
  0x86   : > { %v259_v6 = vpop.permute.xlu0 %258 }
  0xea   : > { %v315_v7 = vpop.f32.mrb[0].mxu0 }
  0xeb   : > { %v316_v8 = vadd.f32 %v315_v7, %v259_v6  ;;  %v317_v9 = vpop.f32.mrb[1].mxu0 }
  0xec   : > { %v318_v10 = vadd.f32 %v317_v9, %v259_v6  ;;  %v319_v11 = vpop.f32.mrb[2].mxu0 }
  0xed   : > { %v712_v12 = vmul.f32 -1.442695, %v316_v8  ;;  %v320_v13 = vpop.f32.mrb[3].mxu0 }
  0xee   : > { %v713_v14 = vmul.f32 -1.442695, %v318_v10  ;;  %v471_v13 = vrot.slane %v342_v0, %v860_v31 }
  0xef   : > { %743 = vpow2.f32 %v712_v12 }
  0xf0   : > { %745 = vpow2.f32 %v713_v14  ;;  %v475_v14 = vrot.slane %v342_v0, %v862_v32 }
  0xf9   : > { %v744_v15 = vpop.eup %743 }
  0xfa   : > { %v746_v16 = vpop.eup %745  ;;  %v328_v17 = vadd.f32 1.0, %v744_v15 }
  0xfb   : > { %v329_v18 = vadd.f32 1.0, %v746_v16 }
  0xfc   : > { %747 = vrcp.f32 %v328_v17 }
  0xfd   : > { %749 = vrcp.f32 %v329_v18 }
 0x106   : > { %v748_v19 = vpop.eup %747 }
 0x107   : > { %v835_v20 = vmul.f32 %v748_v19, %v316_v8  ;;  %v750_v21 = vpop.eup %749 }
 0x108   : > { %v839_v22 = vmul.f32 %v750_v21, %v318_v10 }
 0x109   : > { %407 = vrot.lane.b32.xlu1 %v835_v20, %s768_s7  ;;  %367 = vrot.lane.b32.xlu0 %v835_v20, %s769_s8 }
 0x10a   : > { %v439_v49 = vmul.f32 %v435_v41, %v839_v22 }
 0x10d   : > { %345 = vrot.lane.b32.xlu1 %v835_v20, %s770_s9  ;;  %409 = vrot.lane.b32.xlu0 %v839_v22, %s768_s7 }
 0x111   : > { %387 = vrot.lane.b32.xlu1 %v835_v20, %s771_s10  ;;  %347 = vrot.lane.b32.xlu0 %v839_v22, %s770_s9 }
 0x115   : > { %440 = vrot.lane.b32.xlu1 %v835_v20, %s772_s11  ;;  %389 = vrot.lane.b32.xlu0 %v839_v22, %s771_s10 }
 0x119   : > { %369 = vrot.lane.b32.xlu1 %v839_v22, %s769_s8  ;;  %442 = vrot.lane.b32.xlu0 %v839_v22, %s772_s11 }
 0x11d   : > { %480 = vrot.lane.b32.xlu1 %v835_v20, %s773_s12  ;;  %482 = vrot.lane.b32.xlu0 %v839_v22, %s773_s12 }
 0x121   : > { %460 = vrot.lane.b32.xlu1 %v835_v20, %s774_s13  ;;  %462 = vrot.lane.b32.xlu0 %v839_v22, %s774_s13 }
 0x125   : > { %500 = vrot.lane.b32.xlu1 %v835_v20, %s775_s14  ;;  %502 = vrot.lane.b32.xlu0 %v839_v22, %s775_s14 }
 0x129   : > { %563 = vperm.xlu1 %742, %v560_v23  }
 0x17b   : > { %v408_v25 = vpop.permute.xlu1 %407  ;;  %v368_v26 = vpop.permute.xlu0 %367 }
 0x17f   : > { %v346_v28 = vpop.permute.xlu1 %345  ;;  %v410_v29 = vpop.permute.xlu0 %409 }
 0x180   : > { %v412_v50 = vsel %vm411_vm2, %v408_v25, %v410_v29  ;;  %v413_v51 = vsel %vm411_vm2, %v410_v29, %v408_v25 }
 0x181   : > { %v425_v61 = vmul.f32 %v418_v39, %v413_v51  ;;  %v426_v62 = vmul.f32 %v422_v43, %v412_v50  ;;  %v344_v39 = vld [vmem:[%s979_s1 + $0x10] sm:$0x3] }
 0x183   : > { %v388_v36 = vpop.permute.xlu1 %387  ;;  %v348_v37 = vpop.permute.xlu0 %347  ;;  %v528_v15 = vrot.slane %v425_v61, 4  ;;  %v529_v16 = vrot.slane %v426_v62, 4 }
 0x184   : > { %v352_v1 = vsel %vm351_vm3, %v346_v28, %v348_v37  ;;  %v353_v2 = vsel %vm351_vm3, %v348_v37, %v346_v28 }
 0x185   : > { %v365_v17 = vmul.f32 %v358_v44, %v353_v2  ;;  %v366_v18 = vmul.f32 %v362_v45, %v352_v1  ;;  %v438_v44 = vmul.f32 %v431_v42, %v835_v20  ;;  %v511_v20 = vrot.slane %v344_v39, %v860_v31  ;;  %v559_v2 = vld [vmem:[%s982_s4] sm:$0x3] }
 0x186   : > { %v515_v42 = vrot.slane %v344_v39, %v862_v32 }
 0x187   : > { %v441_v52 = vpop.permute.xlu1 %440  ;;  %v390_v53 = vpop.permute.xlu0 %389 }
 0x188   : > { %v392_v56 = vsel %vm391_vm4, %v388_v36, %v390_v53  ;;  %v393_v57 = vsel %vm391_vm4, %v390_v53, %v388_v36 }
 0x189   : > { %v405_v3 = vmul.f32 %v398_v46, %v393_v57  ;;  %v406_v4 = vmul.f32 %v402_v47, %v392_v56 }
 0x18b   : > { %v370_v5 = vpop.permute.xlu1 %369  ;;  %v443_v6 = vpop.permute.xlu0 %442  ;;  %v548_v29 = vsel %vm544_vm7, %v406_v4, %v529_v16  ;;  %v547_v33 = vsel %vm544_vm7, %v405_v3, %v528_v15 }
 0x18c   : > { %v372_v7 = vsel %vm371_vm5, %v368_v26, %v370_v5  ;;  %v373_v8 = vsel %vm371_vm5, %v370_v5, %v368_v26  ;;  %v445_v9 = vsel %vm444_vm6, %v441_v52, %v443_v6  ;;  %v446_v10 = vsel %vm444_vm6, %v443_v6, %v441_v52 }
 0x18d   : > { %v385_v11 = vmul.f32 %v378_v54, %v373_v8  ;;  %v386_v12 = vmul.f32 %v382_v55, %v372_v7  ;;  %v458_v23 = vmul.f32 %v451_v58, %v445_v9  ;;  %v459_v24 = vmul.f32 %v455_v59, %v446_v10 }
 0x18f   : > { %v522_v19 = vrot.slane %v385_v11, 4  ;;  %v523_v21 = vrot.slane %v386_v12, 4  ;;  %v481_v25 = vpop.permute.xlu1 %480  ;;  %v483_v26 = vpop.permute.xlu0 %482  ;;  %v534_v45 = vrot.slane %v458_v23, 4  ;;  %v535_v46 = vrot.slane %v459_v24, 4 }
 0x190   : > { %v485_v27 = vsel %vm484_vm8, %v481_v25, %v483_v26  ;;  %v486_v28 = vsel %vm484_vm8, %v483_v26, %v481_v25 }
 0x191   : > { %v498_v35 = vmul.f32 %v491_v60, %v485_v27  ;;  %v499_v36 = vmul.f32 %v495_v63, %v486_v28  ;;  %v546_v37 = vsel %vm544_vm7, %v366_v18, %v523_v21  ;;  %v545_v38 = vsel %vm544_vm7, %v365_v17, %v522_v19 }
 0x192   : > { %v554_v40 = vpack.c.bf16 %v548_v29, %v546_v37  ;;  %v553_v43 = vpack.c.bf16 %v547_v33, %v545_v38  ;;  %v550_v22 = vsel %vm544_vm7, %v439_v49, %v535_v46  ;;  %v549_v41 = vsel %vm544_vm7, %v438_v44, %v534_v45 }
 0x193   : > { %v461_v47 = vpop.permute.xlu1 %460  ;;  %v463_v48 = vpop.permute.xlu0 %462  ;;  %v540_v52 = vrot.slane %v498_v35, 4  ;;  %v541_v53 = vrot.slane %v499_v36, 4 }
 0x194   : > { %v465_v50 = vsel %vm464_vm9, %v461_v47, %v463_v48  ;;  %v466_v51 = vsel %vm464_vm9, %v463_v48, %v461_v47  ;;  %576 = vmatprep.subr.bf16.mxu1 %v554_v40 }
 0x195   : > { %v478_v54 = vmul.f32 %v471_v13, %v465_v50  ;;  %v479_v55 = vmul.f32 %v475_v14, %v466_v51  ;;  %577 = vmatpush1.bf16.msra.mxu1 %v553_v43 }
 0x197   : > { %v501_v56 = vpop.permute.xlu1 %500  ;;  %v503_v57 = vpop.permute.xlu0 %502  ;;  %v552_v34 = vsel %vm544_vm7, %v479_v55, %v541_v53  ;;  %v551_v58 = vsel %vm544_vm7, %v478_v54, %v540_v52 }
 0x198   : > { %v505_v31 = vsel %vm504_vm10, %v501_v56, %v503_v57  ;;  %v506_v32 = vsel %vm504_vm10, %v503_v57, %v501_v56  ;;  %v556_v59 = vpack.c.bf16 %v552_v34, %v550_v22  ;;  %v555_v60 = vpack.c.bf16 %v551_v58, %v549_v41 }
 0x199   : > { %v518_v61 = vmul.f32 %v511_v20, %v505_v31  ;;  %v519_v62 = vmul.f32 %v515_v42, %v506_v32 }
 0x19a   : > { %578 = vmatprep.subr.bf16.mxu1 %v556_v59 }
 0x19b   : > { %v557_v63 = vpack.c.bf16 %v518_v61, %v518_v61  ;;  %v558_v0 = vpack.c.bf16 %v519_v62, %v519_v62  ;;  %579 = vmatpush1.bf16.msra.mxu1 %v555_v60 }
 0x19d   : > { %714 = vmatprep.subr.msk.bf16.mxu1 %vm274_vm0, %v558_v0  ;;  %v571_v1 = vsel %vm274_vm0, %v557_v63, 0 }
 0x19f   : > { %581 = vmatpush1.bf16.msra.mxu1 %v571_v1 }
 0x1a2   : > { %715 = vmatmul.mubr.msk.bf16.vlgmr.msra.gmra.mrb[0].mxu1 %vm566_vm11, %v559_v2 }
 0x1a8   : > { %v564_v30 = vpop.permute.xlu1 %563 }
 0x275   : > { %v610_v3 = vpop.f32.mrb[0].mxu1 }
 0x276   : > { %v611_v4 = vadd.f32 %v610_v3, %v564_v30  ;;  %v612_v5 = vpop.f32.mrb[1].mxu1 }
 0x277   : > { %v613_v6 = vadd.f32 %v612_v5, %v564_v30  ;;  %v614_v7 = vpop.f32.mrb[2].mxu1 }
 0x278   : > { %v716_v8 = vmul.f32 -1.442695, %v611_v4  ;;  %v615_v9 = vpop.f32.mrb[3].mxu1 }
 0x279   : > { %v717_v10 = vmul.f32 -1.442695, %v613_v6 }
 0x27a   : > { %751 = vpow2.f32 %v716_v8 }
 0x27b   : > { %753 = vpow2.f32 %v717_v10 }
 0x284   : > { %v752_v11 = vpop.eup %751 }
 0x285   : > { %v754_v12 = vpop.eup %753  ;;  %v623_v13 = vadd.f32 1.0, %v752_v11 }
 0x286   : > { %v624_v14 = vadd.f32 1.0, %v754_v12 }
 0x287   : > { %755 = vrcp.f32 %v623_v13 }
 0x288   : > { %757 = vrcp.f32 %v624_v14 }
 0x291   : > { %v756_v15 = vpop.eup %755 }
 0x292   : > { %v758_v16 = vpop.eup %757  ;;  %v629_v17 = vmul.f32 %v756_v15, %v611_v4 }
 0x293   : > { %v630_v18 = vmul.f32 %v758_v16, %v613_v6 }
 0x295   : > { %v718_v19 = vpack.c.bf16 %v630_v18, %v629_v17 }
 0x297   : > { %719 = vst.sshfl [vmem:[%s251_s18] sm:$0x33 pattern:$0x76325410] %v718_v19 }
 0x298 PF: > { %s16_s21 = sadd.s32 1, %s765_s21  }
 0x299   : > { %p13_p4 = scmp.ge.s32.totalorder %s16_s21, 4  }
 0x29b   :  { %15 = sbr.rel (!%p13_p4) target bundleno = 1 (0x1), region = 74 }

// kernel: c3f_forward.5
= control target key start
LH: loop header
LB: loop body
LE: loop exit
PB: predicated region body
PF: predicated region fallthrough
CT: control target
= control target key end

     0   :  { %s676_s18 = smov 0   ;;  %s678_s19 = smov 0   ;;  %s725_s0 = inlined_call_operand.vmem [shape: bf16[2,4,256], index: 0, kind: input, shape index: {}]   ;;  %s726_s1 = inlined_call_operand.vmem [shape: bf16[2,4,256], index: 1, kind: input, shape index: {}]   ;;  %s727_s2 = inlined_call_operand.vmem [shape: bf16[8,4], index: 2, kind: input, shape index: {}]   ;;  %s728_s3 = inlined_call_operand.vmem [shape: bf16[8,4], index: 3, kind: input, shape index: {}]   ;;  %s729_s4 = inlined_call_operand.vmem [shape: f32[8,1], index: 4, kind: input, shape index: {}]   ;;  %s730_s5 = inlined_call_operand.vmem [shape: bf16[2,8,256], index: 5, kind: output, shape index: {}]  }
   0x1   :  { %s680_s20 = smov 0  }
   0x2 LB: > { %s27_s21 = sadd.s32 1, %s639_s19  ;;  %p565_p0 = scmp.ge.s32.totalorder %s643_s20, 1  ;;  %s643_s20 = sphi %s680_s20, %s15_s20   ;;  %s639_s19 = sphi %s678_s19, %s732_s19   ;;  %s635_s18 = sphi %s676_s18, %s731_s18  }
   0x3   : > { %p29_p1 = scmp.ge.s32.totalorder %s27_s21, 2  ;;  %p225_p2 = scmp.lt.s32.totalorder %s643_s20, 3 }
   0x5   : > { %s734_s21 = smov (%p29_p1, %s27_s21), 0  ;;  %p226_p3 = pnand %p565_p0, %p225_p2 }
   0x6   : > { %p271_p4 = scmp.lt.s32.totalorder (!%p226_p3), %s635_s18, 1  ;;  %v645_v0 = vmov (!%p226_p3), 0   ;;  %v425_v1 = vld [vmem:[%s729_s4] sm:$0xff] (!%p226_p3)  ;;  %vm318_vm0 = vcmask (!%p226_p3), 1041408   ;;  %vm314_vm1 = vcmask (!%p226_p3), 31744  }
   0x7   : > { %229 = sbr.rel (%p226_p3) target bundleno = 273 (0x111), region = 40  ;;  %357 = vmatprep.mubr.bf16.mxu0 (!%p226_p3), %v645_v0  ;;  %416 = vmatprep.mubr.bf16.mxu1 (!%p226_p3), %v645_v0  ;;  %v303_v8 = vld [vmem:[%s728_s3] sm:$0xf] (!%p226_p3) }
   0x8   : > { %612 = vset.pattern.permute.xlu0 (!%p226_p3), %v645_v0  ;;  %v301_v9 = vld [vmem:[%s727_s2] sm:$0xf] (!%p226_p3) }
   0x9   : > { %428 = vperm.xlu0 (!%p226_p3), %612, %v425_v1  }
   0xe   : > { %s736_s18 = smov (!%p271_p4, %s635_s18), 1 }
   0xf   : > { %s583_s24 = sshll.u32 %s736_s18, 2  ;;  %s585_s10 = sshll.u32 %s736_s18, 3 }
  0x10   : > { %s288_s27 = scalar_lea.vmem %s726_s1, %s583_s24  ;;  %s278_s30 = scalar_lea.vmem %s725_s0, %s583_s24 }
  0x11   : > { %v572_v2 = vld.sshfl [vmem:[%s288_s27] sm:$0x33 pattern:$0x76325410]  ;;  %s298_s13 = scalar_lea.vmem %s730_s5, %s585_s10 }
  0x12   : > { %v313_v3 = vcombine.high %v572_v2, %v572_v2  ;;  %v575_v4 = vld.sshfl [vmem:[%s278_s30] sm:$0x33 pattern:$0x76325410]  ;;  %v320_v5 = vsel %vm318_vm0, %v572_v2, 0 }
  0x13   : > { %v374_v6 = vcombine.high %v575_v4, %v575_v4  ;;  %v379_v7 = vsel %vm318_vm0, %v575_v4, 0 }
  0x14   : > { %573 = vmatprep.subr.msk.bf16.mxu0 %vm318_vm0, %v313_v3 }
  0x15   : > { %576 = vmatprep.subr.msk.bf16.mxu1 %vm318_vm0, %v374_v6  ;;  %326 = vmatpush1.bf16.msra.mxu0 %v320_v5 }
  0x16   : > { %385 = vmatpush1.bf16.msra.mxu1 %v379_v7 }
  0x18   : > { %574 = vmatmul.mubr.msk.bf16.vlgmr.msra.gmra.mrb[0].mxu0 %vm314_vm1, %v303_v8 }
  0x19   : > { %577 = vmatmul.mubr.msk.bf16.vlgmr.msra.gmra.mrb[0].mxu1 %vm314_vm1, %v301_v9 }
  0x88   : > { %v429_v11 = vpop.permute.xlu0 %428 }
  0xeb   : > { %v359_v10 = vpop.f32.mrb[0].mxu0 }
  0xec   : > { %v418_v12 = vpop.f32.mrb[0].mxu1  ;;  %v361_v13 = vpop.f32.mrb[1].mxu0 }
  0xed   : > { %v419_v14 = vadd.f32 %v418_v12, %v359_v10  ;;  %v420_v15 = vpop.f32.mrb[1].mxu1  ;;  %v363_v16 = vpop.f32.mrb[2].mxu0 }
  0xee   : > { %v421_v17 = vadd.f32 %v420_v15, %v361_v13  ;;  %v422_v18 = vpop.f32.mrb[2].mxu1  ;;  %v364_v19 = vpop.f32.mrb[3].mxu0 }
  0xef   : > { %v431_v20 = vadd.f32 %v429_v11, %v419_v14  ;;  %v423_v21 = vpop.f32.mrb[3].mxu1 }
  0xf0   : > { %v432_v22 = vadd.f32 %v429_v11, %v421_v17 }
  0xf1   : > { %v578_v23 = vmul.f32 -1.442695, %v431_v20 }
  0xf2   : > { %v579_v24 = vmul.f32 -1.442695, %v432_v22 }
  0xf3   : > { %613 = vpow2.f32 %v578_v23 }
  0xf4   : > { %615 = vpow2.f32 %v579_v24 }
  0xfd   : > { %v614_v25 = vpop.eup %613 }
  0xfe   : > { %v616_v26 = vpop.eup %615  ;;  %v439_v27 = vadd.f32 1.0, %v614_v25 }
  0xff   : > { %v440_v28 = vadd.f32 1.0, %v616_v26 }
 0x100   : > { %617 = vrcp.f32 %v439_v27 }
 0x101   : > { %619 = vrcp.f32 %v440_v28 }
 0x10a   : > { %v618_v29 = vpop.eup %617 }
 0x10b   : > { %v620_v30 = vpop.eup %619  ;;  %v445_v31 = vmul.f32 %v618_v29, %v431_v20 }
 0x10c   : > { %v446_v32 = vmul.f32 %v620_v30, %v432_v22 }
 0x10e   : > { %v586_v33 = vpack.c.bf16 %v446_v32, %v445_v31 }
 0x110   : > { %455 = vst [vmem:[%s298_s13] sm:$0xff] %v586_v33 }
 0x111 PF: > { %s15_s20 = sadd.s32 1, %s643_s20   ;;  %s731_s18 = smov %s639_s19 }
 0x112   : > { %p12_p5 = scmp.ge.s32.totalorder %s15_s20, 4   ;;  %s732_s19 = smov %s734_s21 }
 0x114   :  { %14 = sbr.rel (!%p12_p5) target bundleno = 2 (0x2), region = 73 }

</bundles_post_ra>
